<compile_context>
chip_gen: v6e
topology: v6e:2x2x1
jax: 0.10.0
libtpu: 0.0.40
codegen_flags: <defaults>
</compile_context>

<pallas_src>
import jax
import jax.numpy as jnp
from jax.experimental import pallas as pl
from jax.experimental.pallas import tpu as pltpu

LATENT_DIMS = 2
IN_FEATURES = 784   # 28*28 MNIST
HIDDEN = 512
OUT_LANES = 128     # lane-dense fused output slab width


def vae_encoder_kernel(x_ref, w1_ref, b1_ref, w23_ref, b23_ref, eps_ref, out_ref):
    # x: (tb, 784) f32 in HBM/VMEM; cast to bf16 here (halves x HBM traffic vs a
    # wrapper-side cast), f32 MXU accumulation via preferred_element_type.
    xb = x_ref[...].astype(jnp.bfloat16)
    h = jnp.dot(xb, w1_ref[...], preferred_element_type=jnp.float32) + b1_ref[...]
    h = jnp.maximum(h, 0.0).astype(jnp.bfloat16)

    # fused heads, lane-padded: cols [0:L) = mu, [L:2L) = log-sigma pre-act, rest zero.
    heads = jnp.dot(h, w23_ref[...], preferred_element_type=jnp.float32) + b23_ref[...]
    mu = heads[:, :LATENT_DIMS]
    s_pre = heads[:, LATENT_DIMS:2 * LATENT_DIMS]
    sigma = jnp.exp(s_pre)

    # reparameterization: z = mu + sigma * eps   (eps ~ N(0,1) sampled outside)
    z = mu + sigma * eps_ref[...]

    # per-row KL partial; log(sigma) == s_pre algebraically (no log / exp round trip)
    kl_row = jnp.sum(sigma * sigma + mu * mu - s_pre - 0.5, axis=1, keepdims=True)

    # single lane-dense (tb, 128) output slab: z in lanes 0:2, kl in lane 2, zeros after
    pad = jnp.zeros((z.shape[0], OUT_LANES - (LATENT_DIMS + 1)), jnp.float32)
    out_ref[...] = jnp.concatenate([z, kl_row, pad], axis=1)


def prepare_params(params, dtype=jnp.bfloat16):
    """One-time weight prep: transpose to (in, out), fuse + lane-pad heads, cast to bf16."""
    w1, b1, w2, b2, w3, b3 = params
    w1t = jnp.transpose(w1).astype(dtype)                                   # (784, 512)
    w23 = jnp.concatenate([jnp.transpose(w2), jnp.transpose(w3)], axis=1)   # (512, 4)
    w23t = (jnp.zeros((HIDDEN, OUT_LANES), jnp.float32)
            .at[:, :2 * LATENT_DIMS].set(w23).astype(dtype))                # (512, 128)
    b1r = b1.reshape(1, -1).astype(jnp.float32)                             # (1, 512)
    b23 = jnp.concatenate([b2, b3])
    b23r = (jnp.zeros((1, OUT_LANES), jnp.float32)
            .at[0, :2 * LATENT_DIMS].set(b23))                              # (1, 128)
    return w1t, b1r, w23t, b23r


def _round_up(x, m):
    return ((x + m - 1) // m) * m


def _choose_tile(B, tile_b):
    """Batch tile: multiple of 8 (f32 x is cast in-kernel), large by default, and split
    so v7x's two TensorCores both get a block whenever the batch allows it."""
    if B <= 8:
        return B, 1                       # single full-array block (allowed even if B<8)
    tb = max(8, (min(int(tile_b), 1024) // 8) * 8)
    tb = min(tb, _round_up(B, 8))
    if tb >= B:                           # would be a single block -> split for megacore
        tb = max(8, _round_up((B + 1) // 2, 8))
    return tb, pl.cdiv(B, tb)


def variational_encoder_forward(x_nchw, prepped, eps, *, tile_b=512):
    """x_nchw: (B, 1, 28, 28). Returns (z (B, latent_dims) f32, kl scalar f32)."""
    w1t, b1r, w23t, b23r = prepped
    B = x_nchw.shape[0]
    L = LATENT_DIMS

    x_flat = x_nchw.reshape(B, -1).astype(jnp.float32)   # torch.flatten(x, 1); bf16 cast in-kernel
    eps_f = eps.astype(jnp.float32)

    tb, num_blocks = _choose_tile(B, tile_b)

    out = pl.pallas_call(
        vae_encoder_kernel,
        out_shape=jax.ShapeDtypeStruct((B, OUT_LANES), jnp.float32),
        grid=(num_blocks,),
        in_specs=[
            pl.BlockSpec((tb, IN_FEATURES), lambda i: (i, 0)),        # x tile (f32)
            pl.BlockSpec((IN_FEATURES, HIDDEN), lambda i: (0, 0)),    # w1 (VMEM-resident)
            pl.BlockSpec((1, HIDDEN), lambda i: (0, 0)),              # b1 (VMEM-resident)
            pl.BlockSpec((HIDDEN, OUT_LANES), lambda i: (0, 0)),      # fused head W (padded)
            pl.BlockSpec((1, OUT_LANES), lambda i: (0, 0)),           # fused head b (padded)
            pl.BlockSpec((tb, L), lambda i: (i, 0)),                  # eps tile
        ],
        out_specs=pl.BlockSpec((tb, OUT_LANES), lambda i: (i, 0)),    # fused z/kl slab
        compiler_params=pltpu.CompilerParams(
            dimension_semantics=("parallel",),
            vmem_limit_bytes=32 * 1024 * 1024),
    )(x_flat, w1t, b1r, w23t, b23r, eps_f)

    z = out[:, :L]                 # lanes 0:2
    kl = jnp.sum(out[:, L])        # lane 2, per-row partials summed over exactly B rows
    return z, kl


def reference_forward(x_nchw, prepped, eps):
    """Plain-JAX reference using the same bf16 weights / f32 accumulation."""
    w1t, b1r, w23t, b23r = prepped
    B = x_nchw.shape[0]
    xf = x_nchw.reshape(B, -1).astype(jnp.bfloat16)
    h = jnp.dot(xf, w1t, preferred_element_type=jnp.float32) + b1r
    h = jnp.maximum(h, 0.0).astype(jnp.bfloat16)
    heads = jnp.dot(h, w23t, preferred_element_type=jnp.float32) + b23r
    mu = heads[:, :LATENT_DIMS]
    s_pre = heads[:, LATENT_DIMS:2 * LATENT_DIMS]
    sigma = jnp.exp(s_pre)
    z = mu + sigma * eps.astype(jnp.float32)
    kl = jnp.sum(sigma ** 2 + mu ** 2 - s_pre - 0.5)
    return z, kl


def init_params(key):
    """Deterministic init mimicking PyTorch nn.Linear default (U[-1/sqrt(fan_in), +])."""
    k = jax.random.split(key, 6)

    def lin(kw, kb, out_f, in_f):
        bound = 1.0 / jnp.sqrt(jnp.float32(in_f))
        w = jax.random.uniform(kw, (out_f, in_f), jnp.float32, -bound, bound)
        b = jax.random.uniform(kb, (out_f,), jnp.float32, -bound, bound)
        return w, b

    w1, b1 = lin(k[0], k[1], HIDDEN, IN_FEATURES)
    w2, b2 = lin(k[2], k[3], LATENT_DIMS, HIDDEN)
    w3, b3 = lin(k[4], k[5], LATENT_DIMS, HIDDEN)
    return (w1, b1, w2, b2, w3, b3)


if __name__ == "__main__":
    key = jax.random.PRNGKey(0)
    k_params, k_x, k_eps = jax.random.split(key, 3)

    params = init_params(k_params)
    prepped = prepare_params(params)   # one-time: transpose + fuse/pad heads + bf16 cast

    # TODO(synk): torch.distributions.Normal(0,1).sample() has no in-kernel equivalent
    # here; eps is drawn with jax.random outside and passed in (could use pltpu.prng_*).

    # --- small-shape check (single grid step) ---
    B = 8
    x = jax.random.normal(k_x, (B, 1, 28, 28), jnp.float32)        # NCHW like PyTorch
    eps = jax.random.normal(k_eps, (B, LATENT_DIMS), jnp.float32)  # N(0,1) sample

    z, kl = variational_encoder_forward(x, prepped, eps)
    jax.block_until_ready((z, kl))

    z_ref, kl_ref = reference_forward(x, prepped, eps)
    assert jnp.allclose(z, z_ref, atol=2e-3, rtol=2e-3)
    assert jnp.allclose(kl, kl_ref, atol=1e-2, rtol=1e-3)

    # --- second check: multi-block parallel grid + ragged final tile (40 = 16+16+8) ---
    B2 = 40
    x2 = jax.random.normal(jax.random.PRNGKey(1), (B2, 1, 28, 28), jnp.float32)
    eps2 = jax.random.normal(jax.random.PRNGKey(2), (B2, LATENT_DIMS), jnp.float32)
    z2, kl2 = variational_encoder_forward(x2, prepped, eps2, tile_b=16)
    jax.block_until_ready((z2, kl2))
    z2_ref, kl2_ref = reference_forward(x2, prepped, eps2)
    assert jnp.allclose(z2, z2_ref, atol=2e-3, rtol=2e-3)
    assert jnp.allclose(kl2, kl2_ref, atol=2e-2, rtol=1e-3)

    # --- third check: default large-tile path with a medium batch (2 blocks of 64) ---
    B3 = 128
    x3 = jax.random.normal(jax.random.PRNGKey(3), (B3, 1, 28, 28), jnp.float32)
    eps3 = jax.random.normal(jax.random.PRNGKey(4), (B3, LATENT_DIMS), jnp.float32)
    z3, kl3 = variational_encoder_forward(x3, prepped, eps3)
    jax.block_until_ready((z3, kl3))
    z3_ref, kl3_ref = reference_forward(x3, prepped, eps3)
    assert jnp.allclose(z3, z3_ref, atol=2e-3, rtol=2e-3)
    assert jnp.allclose(kl3, kl3_ref, atol=5e-2, rtol=1e-3)

    print("KERNEL_OK")
</pallas_src>

<mosaic_0001>
module attributes {stable_mosaic.version = 11 : i64} {
  func.func @vae_encoder_kernel(%arg0: i32, %arg1: memref<8x784xf32, #tpu.memory_space<vmem>>, %arg2: memref<784x512xbf16, #tpu.memory_space<vmem>>, %arg3: memref<1x512xf32, #tpu.memory_space<vmem>>, %arg4: memref<512x128xbf16, #tpu.memory_space<vmem>>, %arg5: memref<1x128xf32, #tpu.memory_space<vmem>>, %arg6: memref<8x2xf32, #tpu.memory_space<vmem>>, %arg7: memref<8x128xf32, #tpu.memory_space<vmem>>) attributes {dimension_semantics = [#tpu.dimension_semantics<parallel>], iteration_bounds = array<i64: 1>, scalar_prefetch = 0 : i64, scratch_operands = 0 : i64, tpu.core_type = #tpu.core_type<tc>, window_params = [{transform_indices = @transform_0, window_bounds = array<i64: 8, 784>}, {pipeline_mode = #tpu.pipeline_mode<synchronous>, transform_indices = @transform_1, window_bounds = array<i64: 784, 512>}, {pipeline_mode = #tpu.pipeline_mode<synchronous>, transform_indices = @transform_2, window_bounds = array<i64: 1, 512>}, {pipeline_mode = #tpu.pipeline_mode<synchronous>, transform_indices = @transform_3, window_bounds = array<i64: 512, 128>}, {pipeline_mode = #tpu.pipeline_mode<synchronous>, transform_indices = @transform_4, window_bounds = array<i64: 1, 128>}, {transform_indices = @transform_5, window_bounds = array<i64: 8, 2>}, {transform_indices = @transform_6, window_bounds = array<i64: 8, 128>}]} {
    %c0 = arith.constant 0 : index
    %c0_0 = arith.constant 0 : index
    %0 = vector.load %arg1[%c0, %c0_0] : memref<8x784xf32, #tpu.memory_space<vmem>>, vector<8x784xf32>
    %1 = arith.truncf %0 : vector<8x784xf32> to vector<8x784xbf16>
    %c0_1 = arith.constant 0 : index
    %c0_2 = arith.constant 0 : index
    %2 = vector.load %arg2[%c0_1, %c0_2] : memref<784x512xbf16, #tpu.memory_space<vmem>>, vector<784x512xbf16>
    %cst = arith.constant dense<0.000000e+00> : vector<8x512xf32>
    %3 = tpu.matmul %1, %2, %cst {dimension_numbers = #tpu.dot_dimension_numbers<[1], [0], [0], [1], [0, 0, 1, 1], [], []>} : vector<8x784xbf16>, vector<784x512xbf16>, vector<8x512xf32> -> vector<8x512xf32>
    %c0_3 = arith.constant 0 : index
    %c0_4 = arith.constant 0 : index
    %4 = vector.load %arg3[%c0_3, %c0_4] : memref<1x512xf32, #tpu.memory_space<vmem>>, vector<1x512xf32>
    %5 = vector.broadcast %4 : vector<1x512xf32> to vector<8x512xf32>
    %6 = arith.addf %3, %5 : vector<8x512xf32>
    %cst_5 = arith.constant 0.000000e+00 : f32
    %7 = vector.broadcast %cst_5 : f32 to vector<8x512xf32>
    %8 = arith.maximumf %6, %7 : vector<8x512xf32>
    %9 = arith.truncf %8 : vector<8x512xf32> to vector<8x512xbf16>
    %c0_6 = arith.constant 0 : index
    %c0_7 = arith.constant 0 : index
    %10 = vector.load %arg4[%c0_6, %c0_7] : memref<512x128xbf16, #tpu.memory_space<vmem>>, vector<512x128xbf16>
    %cst_8 = arith.constant dense<0.000000e+00> : vector<8x128xf32>
    %11 = tpu.matmul %9, %10, %cst_8 {dimension_numbers = #tpu.dot_dimension_numbers<[1], [0], [0], [1], [0, 0, 1, 1], [], []>} : vector<8x512xbf16>, vector<512x128xbf16>, vector<8x128xf32> -> vector<8x128xf32>
    %c0_9 = arith.constant 0 : index
    %c0_10 = arith.constant 0 : index
    %12 = vector.load %arg5[%c0_9, %c0_10] : memref<1x128xf32, #tpu.memory_space<vmem>>, vector<1x128xf32>
    %13 = vector.broadcast %12 : vector<1x128xf32> to vector<8x128xf32>
    %14 = arith.addf %11, %13 : vector<8x128xf32>
    %15 = vector.extract_strided_slice %14 {offsets = [0, 0], sizes = [8, 2], strides = [1, 1]} : vector<8x128xf32> to vector<8x2xf32>
    %16 = vector.extract_strided_slice %14 {offsets = [0, 2], sizes = [8, 2], strides = [1, 1]} : vector<8x128xf32> to vector<8x2xf32>
    %17 = math.exp %16 : vector<8x2xf32>
    %c0_11 = arith.constant 0 : index
    %c0_12 = arith.constant 0 : index
    %18 = vector.load %arg6[%c0_11, %c0_12] : memref<8x2xf32, #tpu.memory_space<vmem>>, vector<8x2xf32>
    %19 = arith.mulf %17, %18 : vector<8x2xf32>
    %20 = arith.addf %15, %19 : vector<8x2xf32>
    %21 = arith.mulf %17, %17 : vector<8x2xf32>
    %22 = arith.mulf %15, %15 : vector<8x2xf32>
    %23 = arith.addf %21, %22 : vector<8x2xf32>
    %24 = arith.subf %23, %16 : vector<8x2xf32>
    %cst_13 = arith.constant 5.000000e-01 : f32
    %25 = vector.broadcast %cst_13 : f32 to vector<8x2xf32>
    %26 = arith.subf %24, %25 : vector<8x2xf32>
    %cst_14 = arith.constant dense<0.000000e+00> : vector<8xf32>
    %27 = vector.multi_reduction <add>, %26, %cst_14 [1] : vector<8x2xf32> to vector<8xf32>
    %28 = vector.shape_cast %27 : vector<8xf32> to vector<8x1xf32>
    %cst_15 = arith.constant 0.000000e+00 : f32
    %29 = vector.broadcast %cst_15 : f32 to vector<8x125xf32>
    %30 = tpu.concatenate %20, %28, %29 in 1 : vector<8x2xf32>, vector<8x1xf32>, vector<8x125xf32> -> vector<8x128xf32>
    %c0_16 = arith.constant 0 : index
    %c0_17 = arith.constant 0 : index
    %31 = vector.load %arg7[%c0_16, %c0_17] : memref<8x128xf32, #tpu.memory_space<vmem>>, vector<8x128xf32>
    tpu.vector_store %arg7[%c0_16, %c0_17], %30 {strides = array<i32>} : memref<8x128xf32, #tpu.memory_space<vmem>>, vector<8x128xf32>,
    return
  }
  func.func @transform_0(%arg0: i32) -> (i32, i32) {
    %c0_i32 = arith.constant 0 : i32
    %c0_i32_0 = arith.constant 0 : i32
    return %arg0, %c0_i32 : i32, i32
  }
  func.func @transform_1(%arg0: i32) -> (i32, i32) {
    %c0_i32 = arith.constant 0 : i32
    %c0_i32_0 = arith.constant 0 : i32
    %c0_i32_1 = arith.constant 0 : i32
    return %c0_i32, %c0_i32_0 : i32, i32
  }
  func.func @transform_2(%arg0: i32) -> (i32, i32) {
    %c0_i32 = arith.constant 0 : i32
    %c0_i32_0 = arith.constant 0 : i32
    %c0_i32_1 = arith.constant 0 : i32
    return %c0_i32, %c0_i32_0 : i32, i32
  }
  func.func @transform_3(%arg0: i32) -> (i32, i32) {
    %c0_i32 = arith.constant 0 : i32
    %c0_i32_0 = arith.constant 0 : i32
    %c0_i32_1 = arith.constant 0 : i32
    return %c0_i32, %c0_i32_0 : i32, i32
  }
  func.func @transform_4(%arg0: i32) -> (i32, i32) {
    %c0_i32 = arith.constant 0 : i32
    %c0_i32_0 = arith.constant 0 : i32
    %c0_i32_1 = arith.constant 0 : i32
    return %c0_i32, %c0_i32_0 : i32, i32
  }
  func.func @transform_5(%arg0: i32) -> (i32, i32) {
    %c0_i32 = arith.constant 0 : i32
    %c0_i32_0 = arith.constant 0 : i32
    return %arg0, %c0_i32 : i32, i32
  }
  func.func @transform_6(%arg0: i32) -> (i32, i32) {
    %c0_i32 = arith.constant 0 : i32
    %c0_i32_0 = arith.constant 0 : i32
    return %arg0, %c0_i32 : i32, i32
  }
}

</mosaic_0001>

<bundles_post_ra>
// kernel: tpu_custom_call.1
= control target key start
LH: loop header
LB: loop body
LE: loop exit
PB: predicated region body
PF: predicated region fallthrough
CT: control target
= control target key end

     0   :  { %11 = vsyncpa [#allocation3], 0  ;;  %s2811_s0 = inlined_call_operand.hbm [shape: f32[8,784], index: 0, kind: input, shape index: {}]   ;;  %s2812_s1 = inlined_call_operand.hbm [shape: bf16[784,512], index: 1, kind: input, shape index: {}]   ;;  %s2813_s2 = inlined_call_operand.vmem [shape: f32[1,512], index: 2, kind: input, shape index: {}]   ;;  %s2814_s3 = inlined_call_operand.hbm [shape: bf16[512,128], index: 3, kind: input, shape index: {}]   ;;  %s2815_s4 = inlined_call_operand.vmem [shape: f32[1,128], index: 4, kind: input, shape index: {}]   ;;  %s2816_s5 = inlined_call_operand.vmem [shape: f32[8,2], index: 5, kind: input, shape index: {}]   ;;  %s2817_s6 = inlined_call_operand.hbm [shape: f32[8,128], index: 6, kind: output, shape index: {}]  }
   0x1   :  { %12 = vsyncpa [#allocation6], 0 }
   0x2   :  { %13 = vsyncpa [#allocation4], 0  ;;  %s2710_s21 = smov [#allocation5]  }
   0x3   :  { %s29_s22 = sshll.u32 %s2710_s21, 4  ;;  %s30_s22 = int_to_ptr.vmem [resolvable:$true] %s29_s22 }
   0x4   :  { %s2632_s23 = scalar_lea.vmem %s30_s22, 25088  ;;  %p2637_p1 = scmp.lt.s32.totalorder %s30_s22, %s30_s22 }
   0x5   :  { %p2633_p0 = scmp.ne.s32.totalorder %s30_s22, %s2632_s23  ;;  %p2638_p2 = scmp.lt.s32.totalorder %s2632_s23, %s2632_s23 }
   0x7   :  { %p2639_p3 = por %p2638_p2, %p2637_p1 }
   0x9   :  { %p2640_p4 = pnand %p2639_p3, %p2633_p0 }
   0xb   :  { %2643 = shalt.err (!%p2640_p4)
}
   0xc   :  { %s2711_s24 = smov 256   ;;  %s2712_s25 = smov 16  }
   0xd   :  { %35 = dma.hbm_to_vmem [thread:$0]  %s2812_s1, 25088, %s30_s22, [#allocation6], %s2711_s24, %s2711_s24, %s2712_s25  }
   0xe   :  { %s2713_s28 = smov [#allocation2]   ;;  %s2714_s30 = smov [#allocation7]  }
   0xf   :  { %s20_s29 = sshll.u32 %s2713_s28, 4  ;;  %s43_s7 = sshll.u32 %s2714_s30, 4  ;;  %s21_s29 = int_to_ptr.vmem [resolvable:$true] %s20_s29  ;;  %s44_s7 = int_to_ptr.vmem [resolvable:$true] %s43_s7 }
  0x10   :  { %s2652_s8 = scalar_lea.vmem %s21_s29, 896  ;;  %p2657_p6 = scmp.lt.s32.totalorder %s21_s29, %s21_s29 }
  0x11   :  { %p2653_p5 = scmp.ne.s32.totalorder %s21_s29, %s2652_s8  ;;  %p2658_p7 = scmp.lt.s32.totalorder %s2652_s8, %s2652_s8 }
  0x13   :  { %p2659_p8 = por %p2658_p7, %p2657_p6 }
  0x15   :  { %p2660_p9 = pnand %p2659_p8, %p2653_p5 }
  0x17   :  { %2663 = shalt.err (!%p2660_p9)
}
  0x18   :  { %23 = dma.hbm_to_vmem [thread:$0]  %s2811_s0, 896, %s21_s29, [#allocation3]  }
  0x19   :  { %s2672_s11 = scalar_lea.vmem %s44_s7, 4096  ;;  %p2677_p11 = scmp.lt.s32.totalorder %s44_s7, %s44_s7 }
  0x1a   :  { %p2673_p10 = scmp.ne.s32.totalorder %s44_s7, %s2672_s11  ;;  %p2678_p12 = scmp.lt.s32.totalorder %s2672_s11, %s2672_s11 }
  0x1c   :  { %p2679_p13 = por %p2678_p12, %p2677_p11 }
  0x1e   :  { %p2680_p0 = pnand %p2679_p13, %p2673_p10 }
  0x20   :  { %2683 = shalt.err (!%p2680_p0)
}
  0x21   :  { %s2715_s1 = smov 64   ;;  %s2716_s12 = smov 4  }
  0x22   :  { %49 = dma.hbm_to_vmem [thread:$0]  %s2814_s3, 4096, %s44_s7, [#allocation6], %s2715_s1, %s2715_s1, %s2716_s12  }
  0x23   :  { %2704 = dma.done.wait [#allocation3], 896  }
  0x24   :  { %2705 = vsyncadd [#allocation3], 4294966400 }
  0x25   :  { %2706 = dma.done.wait [#allocation6], 29184  }
  0x26   :  { %2707 = vsyncadd [#allocation6], 4294938112  ;;  %v2296_v0 = vld [vmem:[#allocation5 + $0xe4] ss:$16 sps:$4 sm:$0xff]   ;;  %v2300_v2 = vld [vmem:[#allocation5 + $0xe0] ss:$16 sps:$4 sm:$0xff]  }
  0x27   :  { %v2298_v1 = vld [vmem:[#allocation5 + $0x2e4] ss:$16 sps:$4 sm:$0xff]   ;;  %1280 = vmatprep.subr.bf16.mxu0 %v2296_v0  ;;  %v2301_v3 = vld [vmem:[#allocation5 + $0x2e0] ss:$16 sps:$4 sm:$0xff]   ;;  %vm1276_vm0 = vcmask 130048   ;;  %s2718_s15 = smov 2  }
  0x28   :  { %1321 = vmatprep.subr.bf16.mxu1 %v2298_v1  ;;  %v2302_v4 = vld [vmem:[#allocation5 + $0xc4] ss:$16 sps:$4 sm:$0xff]   ;;  %1281 = vmatpush1.bf16.msra.mxu0 %v2300_v2  ;;  %v2306_v6 = vld [vmem:[#allocation5 + $0xc0] ss:$16 sps:$4 sm:$0xff]   ;;  %vm1985_vm1 = vcmask 15360   ;;  %s2720_s18 = smov [#allocation8]  }
  0x29   :  { %1322 = vmatpush1.bf16.msra.mxu1 %v2301_v3  ;;  %v2304_v5 = vld [vmem:[#allocation5 + $0x2c4] ss:$16 sps:$4 sm:$0xff]   ;;  %1282 = vmatprep.subr.bf16.mxu0 %v2302_v4  ;;  %v2307_v7 = vld [vmem:[#allocation5 + $0x2c0] ss:$16 sps:$4 sm:$0xff]   ;;  %v64_v4 = vld [vmem:[#allocation2] sm:$0xff]  ;;  %s1999_s19 = sshll.u32 %s2720_s18, 4  ;;  %s2000_s19 = int_to_ptr.vmem [resolvable:$true] %s1999_s19 }
  0x2a   :  { %1323 = vmatprep.subr.bf16.mxu1 %v2304_v5  ;;  %v2308_v8 = vld [vmem:[#allocation5 + $0xa4] ss:$16 sps:$4 sm:$0xff]   ;;  %v2312_v10 = vld [vmem:[#allocation5 + $0xa0] ss:$16 sps:$4 sm:$0xff]   ;;  %v66_v5 = vld [vmem:[#allocation2 + $0x10] sm:$0xff]  ;;  %vm1990_vm2 = vcmask 23552   ;;  %p2689_p2 = scmp.lt.s32.totalorder %s2000_s19, %s2000_s19 }
  0x2b   :  { %v2310_v9 = vld [vmem:[#allocation5 + $0x2a4] ss:$16 sps:$4 sm:$0xff]   ;;  %v2313_v11 = vld [vmem:[#allocation5 + $0x2a0] ss:$16 sps:$4 sm:$0xff]   ;;  %s2684_s20 = scalar_lea.vmem %s2000_s19, 128 }
  0x2c   :  { %1283 = vmatpush1.bf16.msra.mxu0 %v2306_v6  ;;  %v2314_v12 = vld [vmem:[#allocation5 + $0x84] ss:$16 sps:$4 sm:$0xff]   ;;  %v2318_v14 = vld [vmem:[#allocation5 + $0x80] ss:$16 sps:$4 sm:$0xff]   ;;  %p2685_p1 = scmp.ne.s32.totalorder %s2000_s19, %s2684_s20  ;;  %p2690_p3 = scmp.lt.s32.totalorder %s2684_s20, %s2684_s20 }
  0x2d   :  { %1324 = vmatpush1.bf16.msra.mxu1 %v2307_v7  ;;  %1284 = vmatprep.subr.bf16.mxu0 %v2308_v8  ;;  %v2316_v13 = vld [vmem:[#allocation5 + $0x284] ss:$16 sps:$4 sm:$0xff]   ;;  %v2319_v15 = vld [vmem:[#allocation5 + $0x280] ss:$16 sps:$4 sm:$0xff]   ;;  %v2771_v8 = vpack.c.bf16 %v64_v4, %v64_v4  ;;  %v2475_v4 = vld [vmem:[#allocation5 + $0x16c] ss:$16 sps:$4 sm:$0xff]  }
  0x2e   :  { %1325 = vmatprep.subr.bf16.mxu1 %v2310_v9  ;;  %v2320_v16 = vld [vmem:[#allocation5 + $0x64] ss:$16 sps:$4 sm:$0xff]   ;;  %v2324_v18 = vld [vmem:[#allocation5 + $0x60] ss:$16 sps:$4 sm:$0xff]   ;;  %v2773_v9 = vpack.c.bf16 %v66_v5, %v66_v5  ;;  %p2691_p4 = por %p2690_p3, %p2689_p2 }
  0x2f   :  { %v2322_v17 = vld [vmem:[#allocation5 + $0x264] ss:$16 sps:$4 sm:$0xff]   ;;  %v2325_v19 = vld [vmem:[#allocation5 + $0x260] ss:$16 sps:$4 sm:$0xff]  }
  0x30   :  { %1285 = vmatpush1.bf16.msra.mxu0 %v2312_v10  ;;  %v2326_v20 = vld [vmem:[#allocation5 + $0x44] ss:$16 sps:$4 sm:$0xff]   ;;  %v2330_v22 = vld [vmem:[#allocation5 + $0x40] ss:$16 sps:$4 sm:$0xff]   ;;  %p2692_p5 = pnand %p2691_p4, %p2685_p1 }
  0x31   :  { %1326 = vmatpush1.bf16.msra.mxu1 %v2313_v11  ;;  %1286 = vmatprep.subr.bf16.mxu0 %v2314_v12  ;;  %v2328_v21 = vld [vmem:[#allocation5 + $0x244] ss:$16 sps:$4 sm:$0xff]   ;;  %v2331_v23 = vld [vmem:[#allocation5 + $0x240] ss:$16 sps:$4 sm:$0xff]  }
  0x32   :  { %1327 = vmatprep.subr.bf16.mxu1 %v2316_v13  ;;  %v2332_v24 = vld [vmem:[#allocation5 + $0x24] ss:$16 sps:$4 sm:$0xff]   ;;  %v2336_v26 = vld [vmem:[#allocation5 + $0x20] ss:$16 sps:$4 sm:$0xff]   ;;  %v2403_v13 = vld [vmem:[#allocation5 + $0xec] ss:$16 sps:$4 sm:$0xff]  }
  0x33   :  { %v2334_v25 = vld [vmem:[#allocation5 + $0x224] ss:$16 sps:$4 sm:$0xff]   ;;  %v2337_v27 = vld [vmem:[#allocation5 + $0x220] ss:$16 sps:$4 sm:$0xff]  }
  0x34   :  { %1287 = vmatpush1.bf16.msra.mxu0 %v2318_v14  ;;  %v2338_v28 = vld [vmem:[#allocation5 + $0x4] ss:$16 sps:$4 sm:$0xff]   ;;  %v2342_v30 = vld [vmem:[#allocation5] ss:$16 sps:$4 sm:$0xff]  }
  0x35   :  { %1328 = vmatpush1.bf16.msra.mxu1 %v2319_v15  ;;  %1288 = vmatprep.subr.bf16.mxu0 %v2320_v16  ;;  %v2340_v29 = vld [vmem:[#allocation5 + $0x204] ss:$16 sps:$4 sm:$0xff]   ;;  %v2343_v31 = vld [vmem:[#allocation5 + $0x200] ss:$16 sps:$4 sm:$0xff]   ;;  %v70_v15 = vld [vmem:[#allocation2 + $0x30] sm:$0xff]  ;;  %v2717_v16 = vmov 0  }
  0x36   :  { %1329 = vmatprep.subr.bf16.mxu1 %v2322_v17  ;;  %v2344_v32 = vld [vmem:[#allocation5 + $0x1e4] ss:$16 sps:$4 sm:$0xff]   ;;  %v2348_v34 = vld [vmem:[#allocation5 + $0x1e0] ss:$16 sps:$4 sm:$0xff]  }
  0x37   :  { %v2346_v33 = vld [vmem:[#allocation5 + $0x3e4] ss:$16 sps:$4 sm:$0xff]   ;;  %v2349_v35 = vld [vmem:[#allocation5 + $0x3e0] ss:$16 sps:$4 sm:$0xff]  }
  0x38   :  { %1289 = vmatpush1.bf16.msra.mxu0 %v2324_v18  ;;  %v2350_v36 = vld [vmem:[#allocation5 + $0x1c4] ss:$16 sps:$4 sm:$0xff]   ;;  %v2354_v38 = vld [vmem:[#allocation5 + $0x1c0] ss:$16 sps:$4 sm:$0xff]   ;;  %v2401_v18 = vld [vmem:[#allocation5 + $0xe8] ss:$16 sps:$4 sm:$0xff]  }
  0x39   :  { %1330 = vmatpush1.bf16.msra.mxu1 %v2325_v19  ;;  %1290 = vmatprep.subr.bf16.mxu0 %v2326_v20  ;;  %v2352_v37 = vld [vmem:[#allocation5 + $0x3c4] ss:$16 sps:$4 sm:$0xff]   ;;  %v2355_v39 = vld [vmem:[#allocation5 + $0x3c0] ss:$16 sps:$4 sm:$0xff]   ;;  %v2778_v19 = vpack.c.bf16 %v70_v15, %v70_v15  ;;  %v68_v15 = vld [vmem:[#allocation2 + $0x20] sm:$0xff] }
  0x3a   :  { %1331 = vmatprep.subr.bf16.mxu1 %v2328_v21  ;;  %v2356_v40 = vld [vmem:[#allocation5 + $0x1a4] ss:$16 sps:$4 sm:$0xff]   ;;  %v2360_v42 = vld [vmem:[#allocation5 + $0x1a0] ss:$16 sps:$4 sm:$0xff]   ;;  %v2409_v21 = vld [vmem:[#allocation5 + $0xcc] ss:$16 sps:$4 sm:$0xff]  }
  0x3b   :  { %v2358_v41 = vld [vmem:[#allocation5 + $0x3a4] ss:$16 sps:$4 sm:$0xff]   ;;  %v2361_v43 = vld [vmem:[#allocation5 + $0x3a0] ss:$16 sps:$4 sm:$0xff]  }
  0x3c   :  { %1291 = vmatpush1.bf16.msra.mxu0 %v2330_v22  ;;  %v2362_v44 = vld [vmem:[#allocation5 + $0x184] ss:$16 sps:$4 sm:$0xff]   ;;  %v2366_v47 = vld [vmem:[#allocation5 + $0x180] ss:$16 sps:$4 sm:$0xff]  }
  0x3d   :  { %1332 = vmatpush1.bf16.msra.mxu1 %v2331_v23  ;;  %1292 = vmatprep.subr.bf16.mxu0 %v2332_v24  ;;  %v2364_v45 = vld [vmem:[#allocation5 + $0x384] ss:$16 sps:$4 sm:$0xff]   ;;  %v2367_v48 = vld [vmem:[#allocation5 + $0x380] ss:$16 sps:$4 sm:$0xff]   ;;  %v2407_v23 = vld [vmem:[#allocation5 + $0xc8] ss:$16 sps:$4 sm:$0xff]  }
  0x3e   :  { %1333 = vmatprep.subr.bf16.mxu1 %v2334_v25  ;;  %v65_v46 = vld [vmem:[#allocation2 + $0x8] sm:$0xff]  ;;  %v67_v50 = vld [vmem:[#allocation2 + $0x18] sm:$0xff]  ;;  %v2415_v25 = vld [vmem:[#allocation5 + $0xac] ss:$16 sps:$4 sm:$0xff]  }
  0x3f   :  { %v2765_v49 = vpack.c.bf16 %v65_v46, %v65_v46  ;;  %v2368_v51 = vld [vmem:[#allocation5 + $0x164] ss:$16 sps:$4 sm:$0xff]   ;;  %v2767_v52 = vpack.c.bf16 %v67_v50, %v67_v50  ;;  %v2372_v54 = vld [vmem:[#allocation5 + $0x160] ss:$16 sps:$4 sm:$0xff]  }
  0x40   :  { %1293 = vmatpush1.bf16.msra.mxu0 %v2336_v26  ;;  %v2370_v53 = vld [vmem:[#allocation5 + $0x364] ss:$16 sps:$4 sm:$0xff]   ;;  %v2373_v55 = vld [vmem:[#allocation5 + $0x360] ss:$16 sps:$4 sm:$0xff]  }
  0x41   :  { %1334 = vmatpush1.bf16.msra.mxu1 %v2337_v27  ;;  %1294 = vmatprep.subr.bf16.mxu0 %v2338_v28  ;;  %v2374_v56 = vld [vmem:[#allocation5 + $0x144] ss:$16 sps:$4 sm:$0xff]   ;;  %v2378_v58 = vld [vmem:[#allocation5 + $0x140] ss:$16 sps:$4 sm:$0xff]   ;;  %v2413_v27 = vld [vmem:[#allocation5 + $0xa8] ss:$16 sps:$4 sm:$0xff]  }
  0x42   :  { %1335 = vmatprep.subr.bf16.mxu1 %v2340_v29  ;;  %1312 = vmatprep.mubr.bf16.mxu0 %v2765_v49  ;;  %v2376_v57 = vld [vmem:[#allocation5 + $0x344] ss:$16 sps:$4 sm:$0xff]   ;;  %v2379_v59 = vld [vmem:[#allocation5 + $0x340] ss:$16 sps:$4 sm:$0xff]   ;;  %v2421_v29 = vld [vmem:[#allocation5 + $0x8c] ss:$16 sps:$4 sm:$0xff]  }
  0x43   :  { %1353 = vmatprep.mubr.bf16.mxu1 %v2767_v52  ;;  %v2380_v60 = vld [vmem:[#allocation5 + $0x124] ss:$16 sps:$4 sm:$0xff]   ;;  %v2384_v62 = vld [vmem:[#allocation5 + $0x120] ss:$16 sps:$4 sm:$0xff]  }
  0x44   :  { %1295 = vmatpush1.bf16.msra.mxu0 %v2342_v30  ;;  %v2382_v61 = vld [vmem:[#allocation5 + $0x324] ss:$16 sps:$4 sm:$0xff]   ;;  %v2385_v63 = vld [vmem:[#allocation5 + $0x320] ss:$16 sps:$4 sm:$0xff]  }
  0x45   :  { %1336 = vmatpush1.bf16.msra.mxu1 %v2343_v31  ;;  %1296 = vmatprep.subr.bf16.mxu0 %v2344_v32  ;;  %v2386_v0 = vld [vmem:[#allocation5 + $0x104] ss:$16 sps:$4 sm:$0xff]   ;;  %v2390_v2 = vld [vmem:[#allocation5 + $0x100] ss:$16 sps:$4 sm:$0xff]   ;;  %v2419_v31 = vld [vmem:[#allocation5 + $0x88] ss:$16 sps:$4 sm:$0xff]  }
  0x46   :  { %1337 = vmatprep.subr.bf16.mxu1 %v2346_v33  ;;  %v2388_v1 = vld [vmem:[#allocation5 + $0x304] ss:$16 sps:$4 sm:$0xff]   ;;  %v2391_v3 = vld [vmem:[#allocation5 + $0x300] ss:$16 sps:$4 sm:$0xff]   ;;  %v2427_v33 = vld [vmem:[#allocation5 + $0x6c] ss:$16 sps:$4 sm:$0xff]  }
  0x47   :  { %v2394_v6 = vld [vmem:[#allocation5 + $0x4e4] ss:$16 sps:$4 sm:$0xff]   ;;  %v2392_v10 = vld [vmem:[#allocation5 + $0x4e0] ss:$16 sps:$4 sm:$0xff]  }
  0x48   :  { %1297 = vmatpush2.bf16.msra.mxu0 %v2348_v34  ;;  %v2397_v7 = vld [vmem:[#allocation5 + $0x604] ss:$16 sps:$4 sm:$0xff]   ;;  %v2395_v11 = vld [vmem:[#allocation5 + $0x600] ss:$16 sps:$4 sm:$0xff]  }
  0x49   :  { %1338 = vmatpush2.bf16.msra.mxu1 %v2349_v35  ;;  %1298 = vmatprep.subr.bf16.mxu0 %v2350_v36  ;;  %v2400_v12 = vld [vmem:[#allocation5 + $0x4c4] ss:$16 sps:$4 sm:$0xff]   ;;  %v2398_v14 = vld [vmem:[#allocation5 + $0x4c0] ss:$16 sps:$4 sm:$0xff]  }
  0x4a   :  { %1339 = vmatprep.subr.bf16.mxu1 %v2352_v37  ;;  %v2406_v17 = vld [vmem:[#allocation5 + $0x4a4] ss:$16 sps:$4 sm:$0xff]   ;;  %v2404_v20 = vld [vmem:[#allocation5 + $0x4a0] ss:$16 sps:$4 sm:$0xff]   ;;  %v2425_v37 = vld [vmem:[#allocation5 + $0x68] ss:$16 sps:$4 sm:$0xff]  }
  0x4b   :  { %v2412_v22 = vld [vmem:[#allocation5 + $0x484] ss:$16 sps:$4 sm:$0xff]   ;;  %v2410_v24 = vld [vmem:[#allocation5 + $0x480] ss:$16 sps:$4 sm:$0xff]  }
  0x4c   :  { %1299 = vmatpush2.bf16.msra.mxu0 %v2354_v38  ;;  %v2418_v26 = vld [vmem:[#allocation5 + $0x464] ss:$16 sps:$4 sm:$0xff]   ;;  %v2416_v28 = vld [vmem:[#allocation5 + $0x460] ss:$16 sps:$4 sm:$0xff]  }
  0x4d   :  { %1340 = vmatpush2.bf16.msra.mxu1 %v2355_v39  ;;  %1300 = vmatprep.subr.bf16.mxu0 %v2356_v40  ;;  %v2424_v30 = vld [vmem:[#allocation5 + $0x444] ss:$16 sps:$4 sm:$0xff]   ;;  %v2422_v32 = vld [vmem:[#allocation5 + $0x440] ss:$16 sps:$4 sm:$0xff]   ;;  %v2433_v39 = vld [vmem:[#allocation5 + $0x4c] ss:$16 sps:$4 sm:$0xff]  }
  0x4e   :  { %1341 = vmatprep.subr.bf16.mxu1 %v2358_v41  ;;  %v2430_v34 = vld [vmem:[#allocation5 + $0x424] ss:$16 sps:$4 sm:$0xff]   ;;  %v2428_v38 = vld [vmem:[#allocation5 + $0x420] ss:$16 sps:$4 sm:$0xff]   ;;  %v2431_v41 = vld [vmem:[#allocation5 + $0x48] ss:$16 sps:$4 sm:$0xff]  }
  0x4f   :  { %v69_v35 = vld [vmem:[#allocation2 + $0x28] sm:$0xff] }
  0x50   :  { %1301 = vmatpush2.bf16.msra.mxu0 %v2360_v42  ;;  %v2783_v36 = vpack.c.bf16 %v69_v35, %v69_v35  ;;  %v2436_v40 = vld [vmem:[#allocation5 + $0x404] ss:$16 sps:$4 sm:$0xff]   ;;  %v2434_v42 = vld [vmem:[#allocation5 + $0x400] ss:$16 sps:$4 sm:$0xff]   ;;  %v2514_v35 = vld [vmem:[#allocation5 + $0x26c] ss:$16 sps:$4 sm:$0xff]  }
  0x51   :  { %1342 = vmatpush2.bf16.msra.mxu1 %v2361_v43  ;;  %1302 = vmatprep.subr.bf16.mxu0 %v2362_v44  ;;  %v2439_v43 = vld [vmem:[#allocation5 + $0x2c] ss:$16 sps:$4 sm:$0xff]   ;;  %v2442_v44 = vld [vmem:[#allocation5 + $0x5e4] ss:$16 sps:$4 sm:$0xff]   ;;  %v2440_v46 = vld [vmem:[#allocation5 + $0x5e0] ss:$16 sps:$4 sm:$0xff]  }
  0x52   :  { %1343 = vmatprep.subr.bf16.mxu1 %v2364_v45  ;;  %v2437_v45 = vld [vmem:[#allocation5 + $0x28] ss:$16 sps:$4 sm:$0xff]   ;;  %v2446_v50 = vld [vmem:[#allocation5 + $0x5c0] ss:$16 sps:$4 sm:$0xff]   ;;  %v2478_v5 = vld [vmem:[#allocation5 + $0x524] ss:$16 sps:$4 sm:$0xff]  }
  0x54   :  { %1303 = vmatpush2.bf16.msra.mxu0 %v2366_v47  ;;  %v2445_v47 = vld [vmem:[#allocation5 + $0xc] ss:$16 sps:$4 sm:$0xff]  }
  0x55   :  { %1344 = vmatpush2.bf16.msra.mxu1 %v2367_v48  ;;  %1304 = vmatprep.subr.bf16.mxu0 %v2368_v51  ;;  %v2448_v48 = vld [vmem:[#allocation5 + $0x5c4] ss:$16 sps:$4 sm:$0xff]   ;;  %v2451_v51 = vld [vmem:[#allocation5 + $0x1ec] ss:$16 sps:$4 sm:$0xff]  }
  0x56   :  { %1345 = vmatprep.subr.bf16.mxu1 %v2370_v53  ;;  %v2454_v53 = vld [vmem:[#allocation5 + $0x5a4] ss:$16 sps:$4 sm:$0xff]  }
  0x58   :  { %1305 = vmatpush2.bf16.msra.mxu0 %v2372_v54  ;;  %v2449_v54 = vld [vmem:[#allocation5 + $0x1e8] ss:$16 sps:$4 sm:$0xff]  }
  0x59   :  { %1346 = vmatpush2.bf16.msra.mxu1 %v2373_v55  ;;  %1306 = vmatprep.subr.bf16.mxu0 %v2374_v56  ;;  %v2452_v55 = vld [vmem:[#allocation5 + $0x5a0] ss:$16 sps:$4 sm:$0xff]   ;;  %v2457_v56 = vld [vmem:[#allocation5 + $0x1cc] ss:$16 sps:$4 sm:$0xff]  }
  0x5a   :  { %1347 = vmatprep.subr.bf16.mxu1 %v2376_v57  ;;  %v2460_v57 = vld [vmem:[#allocation5 + $0x584] ss:$16 sps:$4 sm:$0xff]  }
  0x5c   :  { %1307 = vmatpush2.bf16.msra.mxu0 %v2378_v58  ;;  %v2455_v58 = vld [vmem:[#allocation5 + $0x1c8] ss:$16 sps:$4 sm:$0xff]  }
  0x5d   :  { %1348 = vmatpush2.bf16.msra.mxu1 %v2379_v59  ;;  %1308 = vmatprep.subr.bf16.mxu0 %v2380_v60  ;;  %v2458_v59 = vld [vmem:[#allocation5 + $0x580] ss:$16 sps:$4 sm:$0xff]   ;;  %v2463_v60 = vld [vmem:[#allocation5 + $0x1ac] ss:$16 sps:$4 sm:$0xff]  }
  0x5e   :  { %1349 = vmatprep.subr.bf16.mxu1 %v2382_v61  ;;  %v2466_v61 = vld [vmem:[#allocation5 + $0x564] ss:$16 sps:$4 sm:$0xff]  }
  0x60   :  { %1309 = vmatpush2.bf16.msra.mxu0 %v2384_v62  ;;  %v2461_v62 = vld [vmem:[#allocation5 + $0x1a8] ss:$16 sps:$4 sm:$0xff]  }
  0x61   :  { %1350 = vmatpush2.bf16.msra.mxu1 %v2385_v63  ;;  %1310 = vmatprep.subr.bf16.mxu0 %v2386_v0  ;;  %v2464_v63 = vld [vmem:[#allocation5 + $0x560] ss:$16 sps:$4 sm:$0xff]   ;;  %v2469_v0 = vld [vmem:[#allocation5 + $0x18c] ss:$16 sps:$4 sm:$0xff]  }
  0x62   :  { %1351 = vmatprep.subr.bf16.mxu1 %v2388_v1  ;;  %v2472_v1 = vld [vmem:[#allocation5 + $0x544] ss:$16 sps:$4 sm:$0xff]  }
  0x64   :  { %1311 = vmatpush2.bf16.msra.mxu0 %v2390_v2  ;;  %v2467_v2 = vld [vmem:[#allocation5 + $0x188] ss:$16 sps:$4 sm:$0xff]  }
  0x65   :  { %1352 = vmatpush2.bf16.msra.mxu1 %v2391_v3  ;;  %1362 = vmatprep.subr.bf16.mxu0 %v2394_v6  ;;  %v2470_v3 = vld [vmem:[#allocation5 + $0x540] ss:$16 sps:$4 sm:$0xff]   ;;  %v2473_v6 = vld [vmem:[#allocation5 + $0x168] ss:$16 sps:$4 sm:$0xff]  }
  0x66   :  { %1417 = vmatprep.subr.bf16.mxu1 %v2397_v7  ;;  %v2476_v7 = vld [vmem:[#allocation5 + $0x520] ss:$16 sps:$4 sm:$0xff]  }
  0x67   :  { %1313 = vmatmul.mubr.bf16.vlgmr.msra.gmra.mxu0 %v2771_v8 }
  0x68   :  { %1354 = vmatmul.mubr.bf16.vlgmr.msra.gmra.mxu1 %v2773_v9  ;;  %1363 = vmatpush1.bf16.msra.mxu0 %v2392_v10  ;;  %v2481_v10 = vld [vmem:[#allocation5 + $0x14c] ss:$16 sps:$4 sm:$0xff]  }
  0x69   :  { %1418 = vmatpush1.bf16.msra.mxu1 %v2395_v11  ;;  %1364 = vmatprep.subr.bf16.mxu0 %v2400_v12  ;;  %v2484_v11 = vld [vmem:[#allocation5 + $0x504] ss:$16 sps:$4 sm:$0xff]   ;;  %v2479_v12 = vld [vmem:[#allocation5 + $0x148] ss:$16 sps:$4 sm:$0xff]  }
  0x6a   :  { %1435 = vmatprep.mubr.bf16.mxu1 %v2717_v16  ;;  %1444 = vmatprep.subr.bf16.mxu1 %v2403_v13  ;;  %v2482_v13 = vld [vmem:[#allocation5 + $0x500] ss:$16 sps:$4 sm:$0xff]  }
  0x6b   :  { %1394 = vmatprep.mubr.bf16.mxu0 %v2783_v36 }
  0x6c   :  { %1365 = vmatpush1.bf16.msra.mxu0 %v2398_v14  ;;  %v2487_v14 = vld [vmem:[#allocation5 + $0x12c] ss:$16 sps:$4 sm:$0xff]  }
  0x6d   :  { %1366 = vmatprep.subr.bf16.mxu0 %v2406_v17  ;;  %v2490_v17 = vld [vmem:[#allocation5 + $0x2ec] ss:$16 sps:$4 sm:$0xff]  }
  0x70   :  { %2205 = vmatmul.mubr.msk.bf16.vlgmr.msra.gmra.mxu1 %vm1276_vm0, %v2778_v19  ;;  %1367 = vmatpush1.bf16.msra.mxu0 %v2404_v20  ;;  %v2786_v20 = vpack.c.bf16 %v68_v15, %v68_v15  ;;  %v2577_v15 = vld [vmem:[#allocation5 + $0x54c] ss:$16 sps:$4 sm:$0xff]  }
  0x71   :  { %1445 = vmatpush1.bf16.msra.mxu1 %v2401_v18  ;;  %1368 = vmatprep.subr.bf16.mxu0 %v2412_v22  ;;  %v2485_v18 = vld [vmem:[#allocation5 + $0x128] ss:$16 sps:$4 sm:$0xff]   ;;  %v2493_v22 = vld [vmem:[#allocation5 + $0x10c] ss:$16 sps:$4 sm:$0xff]  }
  0x72   :  { %1446 = vmatprep.subr.bf16.mxu1 %v2409_v21  ;;  %1476 = vmatprep.mubr.bf16.mxu1 %v2765_v49  ;;  %v2443_v49 = vld [vmem:[#allocation5 + $0x8] ss:$16 sps:$4 sm:$0xff]  }
  0x73   :  { %v2488_v21 = vld [vmem:[#allocation5 + $0x2e8] ss:$16 sps:$4 sm:$0xff]  }
  0x74   :  { %1369 = vmatpush1.bf16.msra.mxu0 %v2410_v24  ;;  %v2491_v24 = vld [vmem:[#allocation5 + $0x108] ss:$16 sps:$4 sm:$0xff]  }
  0x75   :  { %1447 = vmatpush1.bf16.msra.mxu1 %v2407_v23  ;;  %1370 = vmatprep.subr.bf16.mxu0 %v2418_v26  ;;  %v2496_v23 = vld [vmem:[#allocation5 + $0x2cc] ss:$16 sps:$4 sm:$0xff]  }
  0x76   :  { %1448 = vmatprep.subr.bf16.mxu1 %v2415_v25  ;;  %v2494_v25 = vld [vmem:[#allocation5 + $0x2c8] ss:$16 sps:$4 sm:$0xff]   ;;  %v2499_v26 = vld [vmem:[#allocation5 + $0x4ec] ss:$16 sps:$4 sm:$0xff]  }
  0x78   :  { %1371 = vmatpush1.bf16.msra.mxu0 %v2416_v28  ;;  %v2497_v28 = vld [vmem:[#allocation5 + $0x4e8] ss:$16 sps:$4 sm:$0xff]  }
  0x79   :  { %1449 = vmatpush1.bf16.msra.mxu1 %v2413_v27  ;;  %1372 = vmatprep.subr.bf16.mxu0 %v2424_v30  ;;  %v2502_v27 = vld [vmem:[#allocation5 + $0x2ac] ss:$16 sps:$4 sm:$0xff]  }
  0x7a   :  { %1450 = vmatprep.subr.bf16.mxu1 %v2421_v29  ;;  %v2500_v29 = vld [vmem:[#allocation5 + $0x2a8] ss:$16 sps:$4 sm:$0xff]   ;;  %v2505_v30 = vld [vmem:[#allocation5 + $0x4cc] ss:$16 sps:$4 sm:$0xff]  }
  0x7c   :  { %1373 = vmatpush1.bf16.msra.mxu0 %v2422_v32  ;;  %v2503_v32 = vld [vmem:[#allocation5 + $0x4c8] ss:$16 sps:$4 sm:$0xff]  }
  0x7d   :  { %1451 = vmatpush1.bf16.msra.mxu1 %v2419_v31  ;;  %1374 = vmatprep.subr.bf16.mxu0 %v2430_v34  ;;  %v2508_v31 = vld [vmem:[#allocation5 + $0x28c] ss:$16 sps:$4 sm:$0xff]  }
  0x7e   :  { %1452 = vmatprep.subr.bf16.mxu1 %v2427_v33  ;;  %v2506_v33 = vld [vmem:[#allocation5 + $0x288] ss:$16 sps:$4 sm:$0xff]   ;;  %v2511_v34 = vld [vmem:[#allocation5 + $0x4ac] ss:$16 sps:$4 sm:$0xff]  }
  0x80   :  { %1375 = vmatpush1.bf16.msra.mxu0 %v2428_v38  ;;  %v2512_v38 = vld [vmem:[#allocation5 + $0x268] ss:$16 sps:$4 sm:$0xff]  }
  0x81   :  { %1453 = vmatpush1.bf16.msra.mxu1 %v2425_v37  ;;  %1376 = vmatprep.subr.bf16.mxu0 %v2436_v40  ;;  %v2509_v37 = vld [vmem:[#allocation5 + $0x4a8] ss:$16 sps:$4 sm:$0xff]  }
  0x82   :  { %1454 = vmatprep.subr.bf16.mxu1 %v2433_v39  ;;  %v2520_v39 = vld [vmem:[#allocation5 + $0x24c] ss:$16 sps:$4 sm:$0xff]   ;;  %v2515_v40 = vld [vmem:[#allocation5 + $0x488] ss:$16 sps:$4 sm:$0xff]  }
  0x84   :  { %1377 = vmatpush1.bf16.msra.mxu0 %v2434_v42  ;;  %v2523_v42 = vld [vmem:[#allocation5 + $0x46c] ss:$16 sps:$4 sm:$0xff]  }
  0x85   :  { %1455 = vmatpush1.bf16.msra.mxu1 %v2431_v41  ;;  %1378 = vmatprep.subr.bf16.mxu0 %v2442_v44  ;;  %v2518_v41 = vld [vmem:[#allocation5 + $0x248] ss:$16 sps:$4 sm:$0xff]  }
  0x86   :  { %1456 = vmatprep.subr.bf16.mxu1 %v2439_v43  ;;  %v2521_v43 = vld [vmem:[#allocation5 + $0x468] ss:$16 sps:$4 sm:$0xff]  }
  0x87   :  { %v2524_v44 = vld [vmem:[#allocation5 + $0x228] ss:$16 sps:$4 sm:$0xff]  }
  0x88   :  { %1379 = vmatpush2.bf16.msra.mxu0 %v2440_v46  ;;  %v2532_v46 = vld [vmem:[#allocation5 + $0x20c] ss:$16 sps:$4 sm:$0xff]  }
  0x89   :  { %1457 = vmatpush1.bf16.msra.mxu1 %v2437_v45  ;;  %1380 = vmatprep.subr.bf16.mxu0 %v2448_v48  ;;  %v2529_v45 = vld [vmem:[#allocation5 + $0x44c] ss:$16 sps:$4 sm:$0xff]  }
  0x8a   :  { %1458 = vmatprep.subr.bf16.mxu1 %v2445_v47  ;;  %v2530_v47 = vld [vmem:[#allocation5 + $0x208] ss:$16 sps:$4 sm:$0xff]   ;;  %v2535_v48 = vld [vmem:[#allocation5 + $0x42c] ss:$16 sps:$4 sm:$0xff]  }
  0x8c   :  { %1381 = vmatpush2.bf16.msra.mxu0 %v2446_v50  ;;  %v2533_v50 = vld [vmem:[#allocation5 + $0x428] ss:$16 sps:$4 sm:$0xff]  }
  0x8d   :  { %1459 = vmatpush1.bf16.msra.mxu1 %v2443_v49  ;;  %1382 = vmatprep.subr.bf16.mxu0 %v2454_v53  ;;  %v2538_v49 = vld [vmem:[#allocation5 + $0x3ec] ss:$16 sps:$4 sm:$0xff]  }
  0x8e   :  { %1460 = vmatprep.subr.bf16.mxu1 %v2451_v51  ;;  %v2536_v51 = vld [vmem:[#allocation5 + $0x3e8] ss:$16 sps:$4 sm:$0xff]   ;;  %v2541_v53 = vld [vmem:[#allocation5 + $0x40c] ss:$16 sps:$4 sm:$0xff]  }
  0x90   :  { %1383 = vmatpush2.bf16.msra.mxu0 %v2452_v55  ;;  %v2539_v55 = vld [vmem:[#allocation5 + $0x408] ss:$16 sps:$4 sm:$0xff]  }
  0x91   :  { %1461 = vmatpush2.bf16.msra.mxu1 %v2449_v54  ;;  %1384 = vmatprep.subr.bf16.mxu0 %v2460_v57  ;;  %v2544_v54 = vld [vmem:[#allocation5 + $0x3cc] ss:$16 sps:$4 sm:$0xff]  }
  0x92   :  { %1462 = vmatprep.subr.bf16.mxu1 %v2457_v56  ;;  %v2542_v56 = vld [vmem:[#allocation5 + $0x3c8] ss:$16 sps:$4 sm:$0xff]   ;;  %v2547_v57 = vld [vmem:[#allocation5 + $0x5ec] ss:$16 sps:$4 sm:$0xff]  }
  0x94   :  { %1385 = vmatpush2.bf16.msra.mxu0 %v2458_v59  ;;  %v2545_v59 = vld [vmem:[#allocation5 + $0x5e8] ss:$16 sps:$4 sm:$0xff]  }
  0x95   :  { %1463 = vmatpush2.bf16.msra.mxu1 %v2455_v58  ;;  %1386 = vmatprep.subr.bf16.mxu0 %v2466_v61  ;;  %v2550_v58 = vld [vmem:[#allocation5 + $0x3ac] ss:$16 sps:$4 sm:$0xff]  }
  0x96   :  { %1464 = vmatprep.subr.bf16.mxu1 %v2463_v60  ;;  %v2548_v60 = vld [vmem:[#allocation5 + $0x3a8] ss:$16 sps:$4 sm:$0xff]   ;;  %v2553_v61 = vld [vmem:[#allocation5 + $0x5cc] ss:$16 sps:$4 sm:$0xff]  }
  0x98   :  { %1387 = vmatpush2.bf16.msra.mxu0 %v2464_v63  ;;  %v2551_v63 = vld [vmem:[#allocation5 + $0x5c8] ss:$16 sps:$4 sm:$0xff]  }
  0x99   :  { %1465 = vmatpush2.bf16.msra.mxu1 %v2461_v62  ;;  %1388 = vmatprep.subr.bf16.mxu0 %v2472_v1  ;;  %v2556_v62 = vld [vmem:[#allocation5 + $0x38c] ss:$16 sps:$4 sm:$0xff]  }
  0x9a   :  { %1466 = vmatprep.subr.bf16.mxu1 %v2469_v0  ;;  %v2554_v0 = vld [vmem:[#allocation5 + $0x388] ss:$16 sps:$4 sm:$0xff]   ;;  %v2559_v1 = vld [vmem:[#allocation5 + $0x5ac] ss:$16 sps:$4 sm:$0xff]  }
  0x9c   :  { %1389 = vmatpush2.bf16.msra.mxu0 %v2470_v3  ;;  %v2557_v3 = vld [vmem:[#allocation5 + $0x5a8] ss:$16 sps:$4 sm:$0xff]  }
  0x9d   :  { %1467 = vmatpush2.bf16.msra.mxu1 %v2467_v2  ;;  %1390 = vmatprep.subr.bf16.mxu0 %v2478_v5  ;;  %v2562_v2 = vld [vmem:[#allocation5 + $0x36c] ss:$16 sps:$4 sm:$0xff]  }
  0x9e   :  { %1468 = vmatprep.subr.bf16.mxu1 %v2475_v4  ;;  %v2560_v4 = vld [vmem:[#allocation5 + $0x368] ss:$16 sps:$4 sm:$0xff]   ;;  %v2565_v5 = vld [vmem:[#allocation5 + $0x58c] ss:$16 sps:$4 sm:$0xff]  }
  0xa0   :  { %1391 = vmatpush2.bf16.msra.mxu0 %v2476_v7  ;;  %v2563_v7 = vld [vmem:[#allocation5 + $0x588] ss:$16 sps:$4 sm:$0xff]  }
  0xa1   :  { %1469 = vmatpush2.bf16.msra.mxu1 %v2473_v6  ;;  %1392 = vmatprep.subr.bf16.mxu0 %v2484_v11  ;;  %v2568_v6 = vld [vmem:[#allocation5 + $0x34c] ss:$16 sps:$4 sm:$0xff]  }
  0xa2   :  { %1470 = vmatprep.subr.bf16.mxu1 %v2481_v10  ;;  %v2566_v10 = vld [vmem:[#allocation5 + $0x348] ss:$16 sps:$4 sm:$0xff]   ;;  %v2571_v11 = vld [vmem:[#allocation5 + $0x56c] ss:$16 sps:$4 sm:$0xff]  }
  0xa4   :  { %1393 = vmatpush2.bf16.msra.mxu0 %v2482_v13  ;;  %v2569_v13 = vld [vmem:[#allocation5 + $0x568] ss:$16 sps:$4 sm:$0xff]  }
  0xa5   :  { %1471 = vmatpush2.bf16.msra.mxu1 %v2479_v12  ;;  %1485 = vmatprep.subr.bf16.mxu0 %v2490_v17  ;;  %v2574_v12 = vld [vmem:[#allocation5 + $0x32c] ss:$16 sps:$4 sm:$0xff]  }
  0xa6   :  { %1472 = vmatprep.subr.bf16.mxu1 %v2487_v14  ;;  %v2572_v14 = vld [vmem:[#allocation5 + $0x328] ss:$16 sps:$4 sm:$0xff]   ;;  %v2580_v17 = vld [vmem:[#allocation5 + $0x30c] ss:$16 sps:$4 sm:$0xff]  }
  0xa7   :  { %1395 = vmatmul.mubr.bf16.vlgmr.msra.gmra.mxu0 %v2786_v20 }
  0xa8   :  { %1486 = vmatpush1.bf16.msra.mxu0 %v2488_v21  ;;  %1517 = vmatprep.mubr.bf16.mxu0 %v2767_v52  ;;  %v2517_v52 = vld [vmem:[#allocation5 + $0x48c] ss:$16 sps:$4 sm:$0xff]   ;;  %v2578_v21 = vld [vmem:[#allocation5 + $0x308] ss:$16 sps:$4 sm:$0xff]  }
  0xa9   :  { %1473 = vmatpush2.bf16.msra.mxu1 %v2485_v18  ;;  %1487 = vmatprep.subr.bf16.mxu0 %v2496_v23  ;;  %v2575_v18 = vld [vmem:[#allocation5 + $0x548] ss:$16 sps:$4 sm:$0xff]   ;;  %v2586_v23 = vld [vmem:[#allocation5 + $0x60c] ss:$16 sps:$4 sm:$0xff]  }
  0xaa   :  { %1474 = vmatprep.subr.bf16.mxu1 %v2493_v22  ;;  %v2583_v22 = vld [vmem:[#allocation5 + $0x52c] ss:$16 sps:$4 sm:$0xff]  }
  0xac   :  { %1488 = vmatpush1.bf16.msra.mxu0 %v2494_v25  ;;  %v2584_v25 = vld [vmem:[#allocation5 + $0x608] ss:$16 sps:$4 sm:$0xff]  }
  0xad   :  { %1475 = vmatpush2.bf16.msra.mxu1 %v2491_v24  ;;  %1489 = vmatprep.subr.bf16.mxu0 %v2502_v27  ;;  %v2581_v24 = vld [vmem:[#allocation5 + $0x528] ss:$16 sps:$4 sm:$0xff]  }
  0xae   :  { %1526 = vmatprep.subr.bf16.mxu1 %v2499_v26  ;;  %v2589_v26 = vld [vmem:[#allocation5 + $0x50c] ss:$16 sps:$4 sm:$0xff]  }
  0xaf   :  { %v2590_v27 = vld [vmem:[#allocation7 + $0x78] sm:$0xff]  }
  0xb0   :  { %1477 = vmatmul.mubr.bf16.vlgmr.msra.gmra.mxu1 %v2771_v8  ;;  %1490 = vmatpush1.bf16.msra.mxu0 %v2500_v29  ;;  %v2526_v8 = vld [vmem:[#allocation5 + $0x22c] ss:$16 sps:$4 sm:$0xff]  }
  0xb1   :  { %1527 = vmatpush1.bf16.msra.mxu1 %v2497_v28  ;;  %1491 = vmatprep.subr.bf16.mxu0 %v2508_v31  ;;  %v2587_v28 = vld [vmem:[#allocation5 + $0x508] ss:$16 sps:$4 sm:$0xff]   ;;  %v2593_v31 = vld [vmem:[#allocation7 + $0x30] sm:$0xff]  }
  0xb2   :  { %1528 = vmatprep.subr.bf16.mxu1 %v2505_v30  ;;  %1558 = vmatprep.mubr.bf16.mxu1 %v2783_v36  ;;  %v2527_v36 = vld [vmem:[#allocation5 + $0x448] ss:$16 sps:$4 sm:$0xff]   ;;  %v2592_v30 = vld [vmem:[#allocation7 + $0x70] sm:$0xff]  }
  0xb3   :  { %v2591_v29 = vld [vmem:[#allocation7 + $0x38] sm:$0xff]  }
  0xb4   :  { %1492 = vmatpush1.bf16.msra.mxu0 %v2506_v33  ;;  %v2596_v33 = vld [vmem:[#allocation7 + $0x60] sm:$0xff]  }
  0xb5   :  { %1529 = vmatpush1.bf16.msra.mxu1 %v2503_v32  ;;  %1493 = vmatprep.subr.bf16.mxu0 %v2514_v35  ;;  %v2594_v32 = vld [vmem:[#allocation7 + $0x68] sm:$0xff]   ;;  %v2607_v35 = vld [vmem:[#allocation7 + $0xb8] sm:$0xff]  }
  0xb6   :  { %1530 = vmatprep.subr.bf16.mxu1 %v2511_v34  ;;  %v2606_v34 = vld [vmem:[#allocation7 + $0xf8] sm:$0xff]  }
  0xb8   :  { %1494 = vmatpush1.bf16.msra.mxu0 %v2512_v38  ;;  %v2609_v38 = vld [vmem:[#allocation7 + $0xb0] sm:$0xff]  }
  0xb9   :  { %1531 = vmatpush1.bf16.msra.mxu1 %v2509_v37  ;;  %1495 = vmatprep.subr.bf16.mxu0 %v2520_v39  ;;  %v2597_v37 = vld [vmem:[#allocation7 + $0x20] sm:$0xff]   ;;  %v2611_v39 = vld [vmem:[#allocation7 + $0xa8] sm:$0xff]  }
  0xba   :  { %1532 = vmatprep.subr.bf16.mxu1 %v2517_v52  ;;  %v2599_v52 = vld [vmem:[#allocation7 + $0x18] sm:$0xff]  }
  0xbc   :  { %1496 = vmatpush1.bf16.msra.mxu0 %v2518_v41  ;;  %v2612_v41 = vld [vmem:[#allocation7 + $0xe0] sm:$0xff]  }
  0xbd   :  { %1533 = vmatpush1.bf16.msra.mxu1 %v2515_v40  ;;  %1497 = vmatprep.subr.bf16.mxu0 %v2526_v8  ;;  %v2600_v40 = vld [vmem:[#allocation7 + $0x50] sm:$0xff]   ;;  %v2602_v8 = vld [vmem:[#allocation7 + $0x48] sm:$0xff]  }
  0xbe   :  { %1534 = vmatprep.subr.bf16.mxu1 %v2523_v42  ;;  %v2601_v42 = vld [vmem:[#allocation7 + $0x10] sm:$0xff]  }
  0xc0   :  { %1498 = vmatpush1.bf16.msra.mxu0 %v2524_v44  ;;  %v2604_v44 = vld [vmem:[#allocation7 + $0x40] sm:$0xff]  }
  0xc1   :  { %1535 = vmatpush1.bf16.msra.mxu1 %v2521_v43  ;;  %1499 = vmatprep.subr.bf16.mxu0 %v2532_v46  ;;  %v2603_v43 = vld [vmem:[#allocation7 + $0x8] sm:$0xff]   ;;  %v2613_v46 = vld [vmem:[#allocation7 + $0xa0] sm:$0xff]  }
  0xc2   :  { %1536 = vmatprep.subr.bf16.mxu1 %v2529_v45  ;;  %v2605_v45 = vld [vmem:[#allocation7] sm:$0xff]  }
  0xc4   :  { %1500 = vmatpush1.bf16.msra.mxu0 %v2530_v47 }
  0xc5   :  { %1537 = vmatpush1.bf16.msra.mxu1 %v2527_v36  ;;  %1501 = vmatprep.subr.bf16.mxu0 %v2538_v49 }
  0xc6   :  { %1538 = vmatprep.subr.bf16.mxu1 %v2535_v48 }
  0xc8   :  { %1502 = vmatpush2.bf16.msra.mxu0 %v2536_v51  ;;  %v2615_v51 = vld [vmem:[#allocation7 + $0x98] sm:$0xff]  }
  0xc9   :  { %1539 = vmatpush1.bf16.msra.mxu1 %v2533_v50  ;;  %1503 = vmatprep.subr.bf16.mxu0 %v2544_v54  ;;  %v2614_v50 = vld [vmem:[#allocation7 + $0xd8] sm:$0xff]  }
  0xca   :  { %1540 = vmatprep.subr.bf16.mxu1 %v2541_v53 }
  0xcc   :  { %1504 = vmatpush2.bf16.msra.mxu0 %v2542_v56 }
  0xcd   :  { %1541 = vmatpush1.bf16.msra.mxu1 %v2539_v55  ;;  %1505 = vmatprep.subr.bf16.mxu0 %v2550_v58  ;;  %v2617_v58 = vld [vmem:[#allocation7 + $0x90] sm:$0xff]  }
  0xce   :  { %1542 = vmatprep.subr.bf16.mxu1 %v2547_v57  ;;  %v2616_v57 = vld [vmem:[#allocation7 + $0xd0] sm:$0xff]  }
  0xd0   :  { %1506 = vmatpush2.bf16.msra.mxu0 %v2548_v60 }
  0xd1   :  { %1543 = vmatpush2.bf16.msra.mxu1 %v2545_v59  ;;  %1507 = vmatprep.subr.bf16.mxu0 %v2556_v62  ;;  %v2619_v62 = vld [vmem:[#allocation7 + $0x88] sm:$0xff]  }
  0xd2   :  { %1544 = vmatprep.subr.bf16.mxu1 %v2553_v61  ;;  %v2618_v61 = vld [vmem:[#allocation7 + $0xc8] sm:$0xff]  }
  0xd4   :  { %1508 = vmatpush2.bf16.msra.mxu0 %v2554_v0 }
  0xd5   :  { %1545 = vmatpush2.bf16.msra.mxu1 %v2551_v63  ;;  %1509 = vmatprep.subr.bf16.mxu0 %v2562_v2  ;;  %v2621_v2 = vld [vmem:[#allocation7 + $0x80] sm:$0xff]  }
  0xd6   :  { %1546 = vmatprep.subr.bf16.mxu1 %v2559_v1  ;;  %v2620_v1 = vld [vmem:[#allocation7 + $0xc0] sm:$0xff]  }
  0xd8   :  { %1510 = vmatpush2.bf16.msra.mxu0 %v2560_v4  ;;  %v276_v4 = vlaneseq }
  0xd9   :  { %1547 = vmatpush2.bf16.msra.mxu1 %v2557_v3  ;;  %1511 = vmatprep.subr.bf16.mxu0 %v2568_v6  ;;  %v1961_v3 = vld [vmem:[%s2816_s5] sm:$0xff] }
  0xda   :  { %1548 = vmatprep.subr.bf16.mxu1 %v2565_v5  ;;  %1963 = vrot.lane.b32.xlu1 %v1961_v3, %s2718_s15  ;;  %v277_v5 = vshrl.u32 %v276_v4, 7 }
  0xdc   :  { %1512 = vmatpush2.bf16.msra.mxu0 %v2566_v10  ;;  %v278_v6 = vsub.s32 0, %v277_v5  ;;  %v282_v10 = vsub.s32 1, %v277_v5 }
  0xdd   :  { %1549 = vmatpush2.bf16.msra.mxu1 %v2563_v7  ;;  %1513 = vmatprep.subr.bf16.mxu0 %v2574_v12  ;;  %v274_v7 = vld [vmem:[%s2813_s2] sm:$0xf] }
  0xde   :  { %1550 = vmatprep.subr.bf16.mxu1 %v2571_v11  ;;  %v279_v11 = vrot.slane %v274_v7, %v278_v6  ;;  %v283_v12 = vrot.slane %v274_v7, %v282_v10 }
  0xe0   :  { %1514 = vmatpush2.bf16.msra.mxu0 %v2572_v14 }
  0xe1   :  { %1551 = vmatpush2.bf16.msra.mxu1 %v2569_v13  ;;  %1515 = vmatprep.subr.bf16.mxu0 %v2580_v17 }
  0xe2   :  { %1552 = vmatprep.subr.bf16.mxu1 %v2577_v15 }
  0xe4   :  { %1516 = vmatpush2.bf16.msra.mxu0 %v2578_v21 }
  0xe5   :  { %1553 = vmatpush2.bf16.msra.mxu1 %v2575_v18  ;;  %1581 = vmatprep.subr.bf16.mxu0 %v2586_v23 }
  0xe6   :  { %1554 = vmatprep.subr.bf16.mxu1 %v2583_v22 }
  0xe7   :  { %1518 = vmatmul.mubr.bf16.vlgmr.msra.gmra.mxu0 %v2773_v9  ;;  %v2595_v9 = vld [vmem:[#allocation7 + $0x28] sm:$0xff]  }
  0xe8   :  { %1582 = vmatpush1.bf16.msra.mxu0 %v2584_v25  ;;  %1599 = vmatprep.mubr.bf16.mxu0 %v2717_v16  ;;  %v2608_v16 = vld [vmem:[#allocation7 + $0xf0] sm:$0xff]  }
  0xe9   :  { %1555 = vmatpush2.bf16.msra.mxu1 %v2581_v24  ;;  %2241 = vmatprep.subr.bf16.mxu0 %v2590_v27 }
  0xea   :  { %1556 = vmatprep.subr.bf16.mxu1 %v2589_v26 }
  0xed   :  { %1557 = vmatpush2.bf16.msra.mxu1 %v2587_v28 }
  0xee   :  { %2263 = vmatprep.subr.bf16.mxu1 %v2606_v34 }
  0xef   :  { %2206 = vmatmul.mubr.msk.bf16.vlgmr.msra.gmra.mxu0 %vm1276_vm0, %v2778_v19  ;;  %v2610_v19 = vld [vmem:[#allocation7 + $0xe8] sm:$0xff]  }
  0xf0   :  { %1559 = vmatmul.mubr.bf16.vlgmr.msra.gmra.mxu1 %v2786_v20  ;;  %2242 = vmatpush3.bf16.msra.mxu0 %v2591_v29  ;;  %v2598_v20 = vld [vmem:[#allocation7 + $0x58] sm:$0xff]  }
  0xf1   :  { %2243 = vmatprep.subr.bf16.mxu0 %v2592_v30  ;;  %2264 = vmatpush3.bf16.msra.mxu1 %v2607_v35  ;;  %v286_v35 = vsub.s32 2, %v277_v5 }
  0xf2   :  { %2265 = vmatprep.subr.bf16.mxu1 %v2608_v16  ;;  %v290_v16 = vsub.s32 3, %v277_v5 }
  0xf4   :  { %2244 = vmatpush3.bf16.msra.mxu0 %v2593_v31 }
  0xf5   :  { %2245 = vmatprep.subr.bf16.mxu0 %v2594_v32  ;;  %2266 = vmatpush3.bf16.msra.mxu1 %v2609_v38  ;;  %v287_v38 = vrot.slane %v274_v7, %v286_v35 }
  0xf6   :  { %2267 = vmatprep.subr.bf16.mxu1 %v2610_v19  ;;  %v291_v19 = vrot.slane %v274_v7, %v290_v16 }
  0xf8   :  { %2246 = vmatpush3.bf16.msra.mxu0 %v2595_v9 }
  0xf9   :  { %2247 = vmatprep.subr.bf16.mxu0 %v2596_v33  ;;  %2268 = vmatpush3.bf16.msra.mxu1 %v2611_v39 }
  0xfa   :  { %2269 = vmatprep.subr.bf16.mxu1 %v2612_v41 }
  0xfc   :  { %2248 = vmatpush3.bf16.msra.mxu0 %v2597_v37 }
  0xfd   :  { %2249 = vmatprep.subr.bf16.mxu0 %v2598_v20  ;;  %2270 = vmatpush3.bf16.msra.mxu1 %v2613_v46 }
  0xfe   :  { %2271 = vmatprep.subr.bf16.mxu1 %v2614_v50 }
 0x100   :  { %2250 = vmatpush3.bf16.msra.mxu0 %v2599_v52 }
 0x101   :  { %2251 = vmatprep.subr.bf16.mxu0 %v2600_v40  ;;  %2272 = vmatpush3.bf16.msra.mxu1 %v2615_v51 }
 0x102   :  { %2273 = vmatprep.subr.bf16.mxu1 %v2616_v57 }
 0x104   :  { %2252 = vmatpush3.bf16.msra.mxu0 %v2601_v42 }
 0x105   :  { %2253 = vmatprep.subr.bf16.mxu0 %v2602_v8  ;;  %2274 = vmatpush3.bf16.msra.mxu1 %v2617_v58 }
 0x106   :  { %2275 = vmatprep.subr.bf16.mxu1 %v2618_v61 }
 0x108   :  { %2254 = vmatpush3.bf16.msra.mxu0 %v2603_v43 }
 0x109   :  { %2255 = vmatprep.subr.bf16.mxu0 %v2604_v44  ;;  %2276 = vmatpush3.bf16.msra.mxu1 %v2619_v62 }
 0x10a   :  { %2277 = vmatprep.subr.bf16.mxu1 %v2620_v1 }
 0x10c   :  { %2256 = vmatpush3.bf16.msra.mxu0 %v2605_v45 }
 0x10d   :  { %2278 = vmatpush3.bf16.msra.mxu1 %v2621_v2 }
 0x127   :  { %v1314_v36 = vpop.f32.mrf.mxu0 }
 0x128   :  { %v1355_v47 = vpop.f32.mrf.mxu1  ;;  %v1315_v13 = vadd.f32 %v1314_v36, %v279_v11 }
 0x129   :  { %v1316_v48 = vpop.f32.mrf.mxu0 }
 0x12a   :  { %v1357_v49 = vpop.f32.mrf.mxu1  ;;  %v1317_v14 = vadd.f32 %v1316_v48, %v283_v12  ;;  %v1356_v15 = vadd.f32 %v1355_v47, %v1315_v13 }
 0x12b   :  { %v1318_v53 = vpop.f32.mrf.mxu0 }
 0x12c   :  { %v1359_v54 = vpop.f32.mrf.mxu1  ;;  %v1358_v18 = vadd.f32 %v1357_v49, %v1317_v14 }
 0x12d   :  { %v1319_v55 = vpop.f32.mrf.mxu0 }
 0x12e   :  { %v1360_v56 = vpop.f32.mrf.mxu1 }
 0x130   :  { %v1437_v59 = vpop.f32.mrf.mxu1 }
 0x132   :  { %v1439_v60 = vpop.f32.mrf.mxu1 }
 0x134   :  { %v1441_v63 = vpop.f32.mrf.mxu1 }
 0x136   :  { %v1442_v0 = vpop.f32.mrf.mxu1 }
 0x137   :  { %v2207_v0 = vld [vmem:[%s2815_s4] ss:$0 sm:$0xff]  ;;  %s2719_s4 = smov 126  }
 0x167   :  { %v1396_v17 = vpop.f32.mrf.mxu0 }
 0x168   :  { %v1397_v21 = vadd.f32 %v1396_v17, %v1356_v15 }
 0x169   :  { %v1398_v22 = vpop.f32.mrf.mxu0 }
 0x16a   :  { %v1438_v23 = vadd.f32 %v1437_v59, %v1397_v21  ;;  %v1399_v24 = vadd.f32 %v1398_v22, %v1358_v18  ;;  %v1964_v21 = vpop.permute.xlu1 %1963 }
 0x16b   :  { %v1400_v25 = vpop.f32.mrf.mxu0 }
 0x16c   :  { %v1440_v26 = vadd.f32 %v1439_v60, %v1399_v24  ;;  %v1608_v27 = vmax.f32 %v1438_v23, 0.0 }
 0x16d   :  { %v1401_v28 = vpop.f32.mrf.mxu0 }
 0x16e   :  { %v1609_v29 = vmax.f32 %v1440_v26, 0.0  ;;  %v1612_v32 = vpack.c.bf16 %v1608_v27, %v1608_v27 }
 0x170   :  { %v1478_v30 = vpop.f32.mrf.mxu1  ;;  %v1613_v31 = vpack.c.bf16 %v1609_v29, %v1609_v29 }
 0x171   :  { %v1479_v39 = vadd.f32 %v1478_v30, %v287_v38 }
 0x172   :  { %v1480_v9 = vpop.f32.mrf.mxu1  ;;  %1911 = vmatprep.mubr.bf16.mxu0 %v1613_v31 }
 0x173   :  { %1912 = vmatmul.mubr.bf16.vlgmr.msra.gmra.mxu0 %v1612_v32  ;;  %v1481_v41 = vadd.f32 %v1480_v9, %v291_v19 }
 0x174   :  { %v1482_v33 = vpop.f32.mrf.mxu1 }
 0x176   :  { %v1483_v34 = vpop.f32.mrf.mxu1 }
 0x1a7   :  { %v1519_v37 = vpop.f32.mrf.mxu0 }
 0x1a8   :  { %v1520_v42 = vadd.f32 %v1519_v37, %v1479_v39 }
 0x1a9   :  { %v1521_v20 = vpop.f32.mrf.mxu0 }
 0x1aa   :  { %v1522_v44 = vadd.f32 %v1521_v20, %v1481_v41 }
 0x1ab   :  { %v1523_v52 = vpop.f32.mrf.mxu0 }
 0x1ad   :  { %v1524_v40 = vpop.f32.mrf.mxu0 }
 0x1af   :  { %v1601_v43 = vpop.f32.mrf.mxu0 }
 0x1b0   :  { %v1560_v8 = vpop.f32.mrf.mxu1 }
 0x1b1   :  { %v1561_v45 = vadd.f32 %v1560_v8, %v1520_v42  ;;  %v1603_v36 = vpop.f32.mrf.mxu0 }
 0x1b2   :  { %v1562_v46 = vpop.f32.mrf.mxu1 }
 0x1b3   :  { %v1602_v47 = vadd.f32 %v1601_v43, %v1561_v45  ;;  %v1563_v48 = vadd.f32 %v1562_v46, %v1522_v44  ;;  %v1605_v50 = vpop.f32.mrf.mxu0 }
 0x1b4   :  { %v1564_v49 = vpop.f32.mrf.mxu1 }
 0x1b5   :  { %v1604_v51 = vadd.f32 %v1603_v36, %v1563_v48  ;;  %v1610_v53 = vmax.f32 %v1602_v47, 0.0  ;;  %v1606_v55 = vpop.f32.mrf.mxu0 }
 0x1b6   :  { %v1565_v54 = vpop.f32.mrf.mxu1 }
 0x1b7   :  { %v1611_v56 = vmax.f32 %v1604_v51, 0.0  ;;  %v1614_v58 = vpack.c.bf16 %v1610_v53, %v1610_v53 }
 0x1b9   :  { %v1615_v57 = vpack.c.bf16 %v1611_v56, %v1611_v56 }
 0x1bb   :  { %1951 = vmatprep.mubr.bf16.mxu1 %v1615_v57 }
 0x1bc   :  { %1952 = vmatmul.mubr.bf16.vlgmr.msra.gmra.mxu1 %v1614_v58 }
 0x233   :  { %v2257_v59 = vpop.f32.mrf.mxu0 }
 0x235   :  { %v2258_v60 = vpop.f32.mrf.mxu0 }
 0x236   :  { %v2259_v61 = vadd.f32 %v2258_v60, %v2257_v59 }
 0x237   :  { %v2260_v62 = vpop.f32.mrf.mxu0 }
 0x238   :  { %v1914_v3 = vadd.f32 %v2259_v61, %v2207_v0 }
 0x239   :  { %v2261_v63 = vpop.f32.mrf.mxu0 }
 0x27c   :  { %v2279_v1 = vpop.f32.mrf.mxu1 }
 0x27e   :  { %v2280_v2 = vpop.f32.mrf.mxu1 }
 0x27f   :  { %v2281_v4 = vadd.f32 %v2280_v2, %v2279_v1 }
 0x280   :  { %v2282_v5 = vpop.f32.mrf.mxu1 }
 0x281   :  { %v1954_v6 = vadd.f32 %v2281_v4, %v1914_v3 }
 0x282   :  { %v2283_v7 = vpop.f32.mrf.mxu1 }
 0x283   :  { %v1973_v10 = vmul.f32 %v1954_v6, %v1954_v6  ;;  %v1959_v11 = vmul.f32 1.442695, %v1954_v6 }
 0x285   :  { %1975 = vrot.lane.b32.xlu0 %v1973_v10, %s2718_s15  ;;  %2622 = vpow2.f32 %v1959_v11 }
 0x292   :  { %v2623_v12 = vpop.eup %2622 }
 0x293   :  { %v1972_v13 = vmul.f32 %v2623_v12, %v2623_v12  ;;  %v1966_v22 = vmul.f32 %v2623_v12, %v1964_v21 }
 0x2f7   :  { %v1976_v14 = vpop.permute.xlu0 %1975 }
 0x2f8   :  { %v1978_v15 = vadd.f32 %v1976_v14, %v1972_v13 }
 0x2fa   :  { %v1979_v17 = vsub.f32 %v1978_v15, %v1954_v6 }
 0x2fc   :  { %v2240_v18 = vadd.f32 -0.5, %v1979_v17 }
 0x2fe   :  { %1982 = vrot.lane.b32.xlu0 %v2240_v18, %s2719_s4 }
 0x302   :  { %1968 = vrot.lane.b32.xlu0 %v1966_v22, %s2719_s4 }
 0x370   :  { %v1983_v23 = vpop.permute.xlu0 %1982 }
 0x371   :  { %v1986_v24 = vsel %vm1985_vm1, %v1983_v23, 0.0 }
 0x372   :  { %1987 = vadd.xlane.f32.xlu1 %v1986_v24 }
 0x374   :  { %v1969_v25 = vpop.permute.xlu0 %1968 }
 0x375   :  { %v1971_v26 = vadd.f32 %v1969_v25, %v1954_v6 }
 0x3fb   :  { %v1988_v27 = vpop.xlane.xlu1 %1987 }
 0x3fc   :  { %v1989_v28 = vsel %vm1985_vm1, %v1971_v26, %v1988_v27 }
 0x3fd   :  { %v1991_v29 = vsel %vm1990_vm2, %v1989_v28, 0.0 }
 0x3fe   :  { %1992 = vst [vmem:[#allocation8] sm:$0xff] %v1991_v29 }
 0x3ff   :  { %2695 = shalt.err (!%p2692_p5)
}
 0x400   :  { %2002 = dma.vmem_to_hbm [thread:$0]  %s2000_s19, 128, %s2817_s6, [#allocation4]  }
 0x401   :  { %2708 = dma.done.wait [#allocation4], 128  }
 0x402   :  { %2709 = vsyncadd [#allocation4], 4294967168 }
 0x403   :  { %2006 = vsyncpa [#allocation3], 1 }
 0x404   :  { %2007 = vsyncpa [#allocation6], 1 }
 0x405   :  { %2008 = vsyncpa [#allocation4], 1 }

</bundles_post_ra>
